<compile_context>
chip_gen: v6e
topology: v6e:2x2x1
jax: 0.10.0
libtpu: 0.0.40
codegen_flags: <defaults>
</compile_context>

<pallas_src>
import math
import functools

import jax
import jax.numpy as jnp
import numpy as np
from jax.experimental import pallas as pl
from jax.experimental.pallas import tpu as pltpu


def _mha_kernel(x_ref, wqkv_ref, bqkv_ref, wout_ref, bout_ref, out_ref,
                *probs_refs, num_heads, head_size, matmul_dtype):
    """Fused MHA for a block of Bt batch elements.

    x_ref     : (Bt, S, H)        input block
    wqkv_ref  : (H, 3H)           qkv projection weight ((in, out) layout, matmul dtype)
    bqkv_ref  : (1, 3H)           qkv projection bias (f32)
    wout_ref  : (H, H)            output projection weight ((in, out) layout, matmul dtype)
    bout_ref  : (1, H)            output projection bias (f32)
    out_ref   : (Bt, S, H)        attention output block
    probs_refs: () or ((Bt, nh, S, S) ref,) -- only present when output_attentions=True
    """
    Bt, S, H = x_ref.shape
    nh, hd = num_heads, head_size

    # ---- fused QKV projection: one (Bt*S, H) @ (H, 3H) MXU pass (f32 accumulate) ----
    x2d = x_ref[...].reshape(Bt * S, H).astype(matmul_dtype)
    qkv = jnp.dot(x2d, wqkv_ref[...], preferred_element_type=jnp.float32)
    qkv = qkv + bqkv_ref[...]                                   # bias in f32

    # Fold 1/sqrt(hd) into q (Bt*S*H elements) instead of scaling nh*(S,S) score tiles.
    q = qkv[:, 0 * H:1 * H] * (1.0 / math.sqrt(hd))
    k = qkv[:, 1 * H:2 * H]
    v = qkv[:, 2 * H:3 * H]

    # ---- split heads -> (Bt*nh, S, hd); batch index is b*nh + h (matches probs layout) ----
    def split_heads(t):                       # t: (Bt*S, H)
        pieces = [t[:, h * hd:(h + 1) * hd].reshape(Bt, 1, S, hd) for h in range(nh)]
        t4 = jnp.concatenate(pieces, axis=1)  # (Bt, nh, S, hd), major-axis concat
        return t4.reshape(Bt * nh, S, hd)

    qh = split_heads(q).astype(matmul_dtype)
    kh = split_heads(k).astype(matmul_dtype)
    vh = split_heads(v).astype(matmul_dtype)

    # ---- batched scores: contraction over d expressed via dot_general (no kh.T relayout) ----
    scores = jnp.einsum('bqd,bkd->bqk', qh, kh,
                        preferred_element_type=jnp.float32)     # (Bt*nh, S, S) f32

    # ---- softmax in f32; divide moved to EUP via approximate reciprocal ----
    m = jnp.max(scores, axis=-1, keepdims=True)
    e = jnp.exp(scores - m)
    denom = jnp.sum(e, axis=-1, keepdims=True)
    probs = e * pl.reciprocal(denom, approx=True)

    if probs_refs:  # probs only materialized / written when requested
        # NOTE: stored in out dtype; a bf16 model loses precision vs the f32 internal probs.
        probs_refs[0][...] = probs.reshape(Bt, nh, S, S).astype(probs_refs[0].dtype)

    # ---- batched context matmul ----
    ctx = jnp.einsum('bqk,bkd->bqd', probs.astype(matmul_dtype), vh,
                     preferred_element_type=jnp.float32)        # (Bt*nh, S, hd) f32
    ctx4 = ctx.reshape(Bt, nh, S, hd)

    # ---- output projection decomposed over heads (accumulate, no head-merge concat) ----
    out = None
    for h in range(nh):
        ctx_h = ctx4[:, h].reshape(Bt * S, hd).astype(matmul_dtype)
        w_h = wout_ref[h * hd:(h + 1) * hd, :]                  # aligned sublane slice
        part = jnp.dot(ctx_h, w_h, preferred_element_type=jnp.float32)
        out = part if out is None else out + part
    out = out + bout_ref[...]
    out_ref[...] = out.reshape(Bt, S, H).astype(out_ref.dtype)


def _pick_batch_tile(B, S, target_rows=256):
    """Largest divisor Bt of B with Bt*S <= target_rows, keeping >=2 grid steps (v7x megacore)."""
    best = 1
    for bt in range(1, B + 1):
        if B % bt != 0:
            continue
        if bt * S > target_rows:
            break
        if B >= 2 and B // bt < 2:
            continue
        best = bt
    return best


def faster_multi_head_attention(x, wqkv, bqkv, wout, bout, *, num_heads,
                                output_attentions=False, batch_tile=None,
                                matmul_dtype=jnp.bfloat16):
    """x: (B, S, H). wqkv: (H, 3H). bqkv: (3H,). wout: (H, H). bout: (H,)."""
    B, S, H = x.shape
    assert H % num_heads == 0
    head_size = H // num_heads

    Bt = batch_tile if batch_tile is not None else _pick_batch_tile(B, S)
    assert B % Bt == 0, "batch tile must divide batch size"

    kernel = functools.partial(_mha_kernel, num_heads=num_heads, head_size=head_size,
                               matmul_dtype=matmul_dtype)

    # Weights cast once in the wrapper -> halves weight DMA/VMEM for bf16; biases stay f32.
    wqkv_mm = wqkv.astype(matmul_dtype)
    wout_mm = wout.astype(matmul_dtype)
    bqkv2 = bqkv.reshape(1, -1).astype(jnp.float32)
    bout2 = bout.reshape(1, -1).astype(jnp.float32)

    in_specs = [
        pl.BlockSpec((Bt, S, H), lambda b: (b, 0, 0)),     # x block
        pl.BlockSpec((H, 3 * H), lambda b: (0, 0)),        # Wqkv (resident across grid)
        pl.BlockSpec((1, 3 * H), lambda b: (0, 0)),        # bqkv
        pl.BlockSpec((H, H), lambda b: (0, 0)),            # Wout (resident across grid)
        pl.BlockSpec((1, H), lambda b: (0, 0)),            # bout
    ]
    out_spec_o = pl.BlockSpec((Bt, S, H), lambda b: (b, 0, 0))
    shape_o = jax.ShapeDtypeStruct((B, S, H), x.dtype)
    compiler_params = pltpu.CompilerParams(dimension_semantics=("parallel",))
    grid = (B // Bt,)

    if output_attentions:
        out, probs = pl.pallas_call(
            kernel,
            out_shape=(shape_o,
                       jax.ShapeDtypeStruct((B, num_heads, S, S), x.dtype)),
            grid_spec=pltpu.PrefetchScalarGridSpec(
                num_scalar_prefetch=0, grid=grid,
                in_specs=in_specs,
                out_specs=(out_spec_o,
                           pl.BlockSpec((Bt, num_heads, S, S),
                                        lambda b: (b, 0, 0, 0)))),
            compiler_params=compiler_params,
        )(x, wqkv_mm, bqkv2, wout_mm, bout2)
        return out, probs

    # Fast path: no (B, nh, S, S) output is allocated, written, or DMA'd.
    out = pl.pallas_call(
        kernel,
        out_shape=shape_o,
        grid_spec=pltpu.PrefetchScalarGridSpec(
            num_scalar_prefetch=0, grid=grid,
            in_specs=in_specs, out_specs=out_spec_o),
        compiler_params=compiler_params,
    )(x, wqkv_mm, bqkv2, wout_mm, bout2)
    return out, None


def _reference(x, wqkv, bqkv, wout, bout, num_heads):
    """Pure-JAX reference mirroring the PyTorch forward (eval mode)."""
    B, S, H = x.shape
    hd = H // num_heads
    qkv = jnp.einsum("bsh,hf->bsf", x, wqkv) + bqkv
    q, k, v = jnp.split(qkv, 3, axis=-1)
    def heads(t):  # (B, S, H) -> (B, nh, S, hd)
        return t.reshape(B, S, num_heads, hd).transpose(0, 2, 1, 3)
    q, k, v = heads(q), heads(k), heads(v)
    scores = jnp.einsum("bhqd,bhkd->bhqk", q, k) / math.sqrt(hd)
    probs = jax.nn.softmax(scores, axis=-1)
    ctx = jnp.einsum("bhqk,bhkd->bhqd", probs, v)
    ctx = ctx.transpose(0, 2, 1, 3).reshape(B, S, H)
    out = jnp.einsum("bsh,hf->bsf", ctx, wout) + bout
    return out, probs


if __name__ == "__main__":
    # config: hidden_size=32, num_attention_heads=4, qkv_bias=True, dropout=0.0
    B, S, H = 2, 8, 32
    NUM_HEADS = 4

    key = jax.random.PRNGKey(0)
    k_x, k_wqkv, k_bqkv, k_wout, k_bout = jax.random.split(key, 5)

    x = jax.random.normal(k_x, (B, S, H), dtype=jnp.float32)

    # Parameters created in PyTorch Linear layout (out, in), transposed to (in, out) (glue).
    w_qkv_pt = jax.random.normal(k_wqkv, (3 * H, H), dtype=jnp.float32) * 0.05
    b_qkv = jax.random.normal(k_bqkv, (3 * H,), dtype=jnp.float32) * 0.05
    w_out_pt = jax.random.normal(k_wout, (H, H), dtype=jnp.float32) * 0.05
    b_out = jax.random.normal(k_bout, (H,), dtype=jnp.float32) * 0.05

    wqkv = w_qkv_pt.T        # (H, 3H)
    wout = w_out_pt.T        # (H, H)

    ref_out, ref_probs = _reference(x, wqkv, b_qkv, wout, b_out, NUM_HEADS)

    # 1) f32-matmul variant, with attention probs (tolerance covers the approx EUP reciprocal).
    out32, probs32 = faster_multi_head_attention(
        x, wqkv, b_qkv, wout, b_out, num_heads=NUM_HEADS,
        output_attentions=True, matmul_dtype=jnp.float32)
    out32 = jax.block_until_ready(out32)
    probs32 = jax.block_until_ready(probs32)
    np.testing.assert_allclose(np.asarray(out32), np.asarray(ref_out), rtol=1e-2, atol=1e-2)
    np.testing.assert_allclose(np.asarray(probs32), np.asarray(ref_probs), rtol=1e-2, atol=1e-2)

    # 2) Default bf16-MXU fast path, probs not requested (no (B,nh,S,S) writeback compiled in).
    out_bf, probs_none = faster_multi_head_attention(
        x, wqkv, b_qkv, wout, b_out, num_heads=NUM_HEADS, output_attentions=False)
    out_bf = jax.block_until_ready(out_bf)
    assert probs_none is None
    np.testing.assert_allclose(np.asarray(out_bf), np.asarray(ref_out), rtol=5e-2, atol=5e-2)

    print("KERNEL_OK")
</pallas_src>

<mosaic_0001>
module attributes {stable_mosaic.version = 11 : i64} {
  func.func @_mha_kernel(%arg0: i32, %arg1: memref<1x8x32xf32, #tpu.memory_space<vmem>>, %arg2: memref<32x96xf32, #tpu.memory_space<vmem>>, %arg3: memref<1x96xf32, #tpu.memory_space<vmem>>, %arg4: memref<32x32xf32, #tpu.memory_space<vmem>>, %arg5: memref<1x32xf32, #tpu.memory_space<vmem>>, %arg6: memref<1x8x32xf32, #tpu.memory_space<vmem>>, %arg7: memref<1x4x8x8xf32, #tpu.memory_space<vmem>>) attributes {dimension_semantics = [#tpu.dimension_semantics<parallel>], iteration_bounds = array<i64: 2>, scalar_prefetch = 0 : i64, scratch_operands = 0 : i64, tpu.core_type = #tpu.core_type<tc>, window_params = [{transform_indices = @transform_0, window_bounds = array<i64: 1, 8, 32>}, {pipeline_mode = #tpu.pipeline_mode<synchronous>, transform_indices = @transform_1, window_bounds = array<i64: 32, 96>}, {pipeline_mode = #tpu.pipeline_mode<synchronous>, transform_indices = @transform_2, window_bounds = array<i64: 1, 96>}, {pipeline_mode = #tpu.pipeline_mode<synchronous>, transform_indices = @transform_3, window_bounds = array<i64: 32, 32>}, {pipeline_mode = #tpu.pipeline_mode<synchronous>, transform_indices = @transform_4, window_bounds = array<i64: 1, 32>}, {transform_indices = @transform_5, window_bounds = array<i64: 1, 8, 32>}, {transform_indices = @transform_6, window_bounds = array<i64: 1, 4, 8, 8>}]} {
    %c0 = arith.constant 0 : index
    %c0_0 = arith.constant 0 : index
    %c0_1 = arith.constant 0 : index
    %0 = vector.load %arg1[%c0, %c0_0, %c0_1] : memref<1x8x32xf32, #tpu.memory_space<vmem>>, vector<1x8x32xf32>
    %1 = vector.shape_cast %0 : vector<1x8x32xf32> to vector<8x32xf32>
    %c0_2 = arith.constant 0 : index
    %c0_3 = arith.constant 0 : index
    %2 = vector.load %arg2[%c0_2, %c0_3] : memref<32x96xf32, #tpu.memory_space<vmem>>, vector<32x96xf32>
    %cst = arith.constant dense<0.000000e+00> : vector<8x96xf32>
    %3 = tpu.matmul %1, %2, %cst {dimension_numbers = #tpu.dot_dimension_numbers<[1], [0], [0], [1], [0, 0, 1, 1], [], []>} : vector<8x32xf32>, vector<32x96xf32>, vector<8x96xf32> -> vector<8x96xf32>
    %c0_4 = arith.constant 0 : index
    %c0_5 = arith.constant 0 : index
    %4 = vector.load %arg3[%c0_4, %c0_5] : memref<1x96xf32, #tpu.memory_space<vmem>>, vector<1x96xf32>
    %5 = vector.broadcast %4 : vector<1x96xf32> to vector<8x96xf32>
    %6 = arith.addf %3, %5 : vector<8x96xf32>
    %7 = vector.extract_strided_slice %6 {offsets = [0, 0], sizes = [8, 32], strides = [1, 1]} : vector<8x96xf32> to vector<8x32xf32>
    %cst_6 = arith.constant 0.353553385 : f32
    %8 = vector.broadcast %cst_6 : f32 to vector<8x32xf32>
    %9 = arith.mulf %7, %8 : vector<8x32xf32>
    %10 = vector.extract_strided_slice %6 {offsets = [0, 32], sizes = [8, 32], strides = [1, 1]} : vector<8x96xf32> to vector<8x32xf32>
    %11 = vector.extract_strided_slice %6 {offsets = [0, 64], sizes = [8, 32], strides = [1, 1]} : vector<8x96xf32> to vector<8x32xf32>
    %12 = vector.extract_strided_slice %9 {offsets = [0, 0], sizes = [8, 8], strides = [1, 1]} : vector<8x32xf32> to vector<8x8xf32>
    %13 = vector.shape_cast %12 : vector<8x8xf32> to vector<1x1x8x8xf32>
    %14 = vector.extract_strided_slice %9 {offsets = [0, 8], sizes = [8, 8], strides = [1, 1]} : vector<8x32xf32> to vector<8x8xf32>
    %15 = vector.shape_cast %14 : vector<8x8xf32> to vector<1x1x8x8xf32>
    %16 = vector.extract_strided_slice %9 {offsets = [0, 16], sizes = [8, 8], strides = [1, 1]} : vector<8x32xf32> to vector<8x8xf32>
    %17 = vector.shape_cast %16 : vector<8x8xf32> to vector<1x1x8x8xf32>
    %18 = vector.extract_strided_slice %9 {offsets = [0, 24], sizes = [8, 8], strides = [1, 1]} : vector<8x32xf32> to vector<8x8xf32>
    %19 = vector.shape_cast %18 : vector<8x8xf32> to vector<1x1x8x8xf32>
    %20 = tpu.concatenate %13, %15, %17, %19 in 1 : vector<1x1x8x8xf32>, vector<1x1x8x8xf32>, vector<1x1x8x8xf32>, vector<1x1x8x8xf32> -> vector<1x4x8x8xf32>
    %21 = vector.shape_cast %20 : vector<1x4x8x8xf32> to vector<4x8x8xf32>
    %22 = vector.extract_strided_slice %10 {offsets = [0, 0], sizes = [8, 8], strides = [1, 1]} : vector<8x32xf32> to vector<8x8xf32>
    %23 = vector.shape_cast %22 : vector<8x8xf32> to vector<1x1x8x8xf32>
    %24 = vector.extract_strided_slice %10 {offsets = [0, 8], sizes = [8, 8], strides = [1, 1]} : vector<8x32xf32> to vector<8x8xf32>
    %25 = vector.shape_cast %24 : vector<8x8xf32> to vector<1x1x8x8xf32>
    %26 = vector.extract_strided_slice %10 {offsets = [0, 16], sizes = [8, 8], strides = [1, 1]} : vector<8x32xf32> to vector<8x8xf32>
    %27 = vector.shape_cast %26 : vector<8x8xf32> to vector<1x1x8x8xf32>
    %28 = vector.extract_strided_slice %10 {offsets = [0, 24], sizes = [8, 8], strides = [1, 1]} : vector<8x32xf32> to vector<8x8xf32>
    %29 = vector.shape_cast %28 : vector<8x8xf32> to vector<1x1x8x8xf32>
    %30 = tpu.concatenate %23, %25, %27, %29 in 1 : vector<1x1x8x8xf32>, vector<1x1x8x8xf32>, vector<1x1x8x8xf32>, vector<1x1x8x8xf32> -> vector<1x4x8x8xf32>
    %31 = vector.shape_cast %30 : vector<1x4x8x8xf32> to vector<4x8x8xf32>
    %32 = vector.extract_strided_slice %11 {offsets = [0, 0], sizes = [8, 8], strides = [1, 1]} : vector<8x32xf32> to vector<8x8xf32>
    %33 = vector.shape_cast %32 : vector<8x8xf32> to vector<1x1x8x8xf32>
    %34 = vector.extract_strided_slice %11 {offsets = [0, 8], sizes = [8, 8], strides = [1, 1]} : vector<8x32xf32> to vector<8x8xf32>
    %35 = vector.shape_cast %34 : vector<8x8xf32> to vector<1x1x8x8xf32>
    %36 = vector.extract_strided_slice %11 {offsets = [0, 16], sizes = [8, 8], strides = [1, 1]} : vector<8x32xf32> to vector<8x8xf32>
    %37 = vector.shape_cast %36 : vector<8x8xf32> to vector<1x1x8x8xf32>
    %38 = vector.extract_strided_slice %11 {offsets = [0, 24], sizes = [8, 8], strides = [1, 1]} : vector<8x32xf32> to vector<8x8xf32>
    %39 = vector.shape_cast %38 : vector<8x8xf32> to vector<1x1x8x8xf32>
    %40 = tpu.concatenate %33, %35, %37, %39 in 1 : vector<1x1x8x8xf32>, vector<1x1x8x8xf32>, vector<1x1x8x8xf32>, vector<1x1x8x8xf32> -> vector<1x4x8x8xf32>
    %41 = vector.shape_cast %40 : vector<1x4x8x8xf32> to vector<4x8x8xf32>
    "tpu.trace_start"() <{level = 10 : i32, message = "bqd,bkd->bqk"}> : () -> ()
    %cst_7 = arith.constant dense<0.000000e+00> : vector<4x8x8xf32>
    %42 = tpu.matmul %21, %31, %cst_7 {dimension_numbers = #tpu.dot_dimension_numbers<[2], [2], [1], [1], [0, 0, 0, 1, 1, 1], [0], [0]>} : vector<4x8x8xf32>, vector<4x8x8xf32>, vector<4x8x8xf32> -> vector<4x8x8xf32>
    "tpu.trace_stop"() : () -> ()
    %cst_8 = arith.constant dense<0xFF800000> : vector<4x8xf32>
    %43 = vector.multi_reduction <maximumf>, %42, %cst_8 [2] : vector<4x8x8xf32> to vector<4x8xf32>
    %44 = vector.shape_cast %43 : vector<4x8xf32> to vector<4x8x1xf32>
    %45 = vector.broadcast %44 : vector<4x8x1xf32> to vector<4x8x8xf32>
    %46 = arith.subf %42, %45 : vector<4x8x8xf32>
    %47 = math.exp %46 : vector<4x8x8xf32>
    %cst_9 = arith.constant dense<0.000000e+00> : vector<4x8xf32>
    %48 = vector.multi_reduction <add>, %47, %cst_9 [2] : vector<4x8x8xf32> to vector<4x8xf32>
    %49 = vector.shape_cast %48 : vector<4x8xf32> to vector<4x8x1xf32>
    %50 = tpu.reciprocal %49 {approx = true} : vector<4x8x1xf32> -> vector<4x8x1xf32>
    %51 = vector.broadcast %50 : vector<4x8x1xf32> to vector<4x8x8xf32>
    %52 = arith.mulf %47, %51 : vector<4x8x8xf32>
    %53 = vector.shape_cast %52 : vector<4x8x8xf32> to vector<1x4x8x8xf32>
    %c0_10 = arith.constant 0 : index
    %c0_11 = arith.constant 0 : index
    %c0_12 = arith.constant 0 : index
    %c0_13 = arith.constant 0 : index
    %54 = vector.load %arg7[%c0_10, %c0_11, %c0_12, %c0_13] : memref<1x4x8x8xf32, #tpu.memory_space<vmem>>, vector<1x4x8x8xf32>
    tpu.vector_store %arg7[%c0_10, %c0_11, %c0_12, %c0_13], %53 {strides = array<i32>} : memref<1x4x8x8xf32, #tpu.memory_space<vmem>>, vector<1x4x8x8xf32>,
    "tpu.trace_start"() <{level = 10 : i32, message = "bqk,bkd->bqd"}> : () -> ()
    %cst_14 = arith.constant dense<0.000000e+00> : vector<4x8x8xf32>
    %55 = tpu.matmul %52, %41, %cst_14 {dimension_numbers = #tpu.dot_dimension_numbers<[2], [1], [1], [2], [0, 0, 0, 1, 1, 2], [0], [0]>} : vector<4x8x8xf32>, vector<4x8x8xf32>, vector<4x8x8xf32> -> vector<4x8x8xf32>
    "tpu.trace_stop"() : () -> ()
    %56 = vector.shape_cast %55 : vector<4x8x8xf32> to vector<1x4x8x8xf32>
    %57 = vector.extract_strided_slice %56 {offsets = [0, 0, 0, 0], sizes = [1, 1, 8, 8], strides = [1, 1, 1, 1]} : vector<1x4x8x8xf32> to vector<1x1x8x8xf32>
    %58 = vector.shape_cast %57 : vector<1x1x8x8xf32> to vector<1x8x8xf32>
    %59 = vector.shape_cast %58 : vector<1x8x8xf32> to vector<8x8xf32>
    %c0_15 = arith.constant 0 : index
    %c0_16 = arith.constant 0 : index
    %60 = vector.load %arg4[%c0_15, %c0_16] : memref<32x32xf32, #tpu.memory_space<vmem>>, vector<8x32xf32>
    %cst_17 = arith.constant dense<0.000000e+00> : vector<8x32xf32>
    %61 = tpu.matmul %59, %60, %cst_17 {dimension_numbers = #tpu.dot_dimension_numbers<[1], [0], [0], [1], [0, 0, 1, 1], [], []>} : vector<8x8xf32>, vector<8x32xf32>, vector<8x32xf32> -> vector<8x32xf32>
    %62 = vector.extract_strided_slice %56 {offsets = [0, 1, 0, 0], sizes = [1, 1, 8, 8], strides = [1, 1, 1, 1]} : vector<1x4x8x8xf32> to vector<1x1x8x8xf32>
    %63 = vector.shape_cast %62 : vector<1x1x8x8xf32> to vector<1x8x8xf32>
    %64 = vector.shape_cast %63 : vector<1x8x8xf32> to vector<8x8xf32>
    %c8 = arith.constant 8 : index
    %c0_18 = arith.constant 0 : index
    %65 = vector.load %arg4[%c8, %c0_18] : memref<32x32xf32, #tpu.memory_space<vmem>>, vector<8x32xf32>
    %cst_19 = arith.constant dense<0.000000e+00> : vector<8x32xf32>
    %66 = tpu.matmul %64, %65, %cst_19 {dimension_numbers = #tpu.dot_dimension_numbers<[1], [0], [0], [1], [0, 0, 1, 1], [], []>} : vector<8x8xf32>, vector<8x32xf32>, vector<8x32xf32> -> vector<8x32xf32>
    %67 = arith.addf %61, %66 : vector<8x32xf32>
    %68 = vector.extract_strided_slice %56 {offsets = [0, 2, 0, 0], sizes = [1, 1, 8, 8], strides = [1, 1, 1, 1]} : vector<1x4x8x8xf32> to vector<1x1x8x8xf32>
    %69 = vector.shape_cast %68 : vector<1x1x8x8xf32> to vector<1x8x8xf32>
    %70 = vector.shape_cast %69 : vector<1x8x8xf32> to vector<8x8xf32>
    %c16 = arith.constant 16 : index
    %c0_20 = arith.constant 0 : index
    %71 = vector.load %arg4[%c16, %c0_20] : memref<32x32xf32, #tpu.memory_space<vmem>>, vector<8x32xf32>
    %cst_21 = arith.constant dense<0.000000e+00> : vector<8x32xf32>
    %72 = tpu.matmul %70, %71, %cst_21 {dimension_numbers = #tpu.dot_dimension_numbers<[1], [0], [0], [1], [0, 0, 1, 1], [], []>} : vector<8x8xf32>, vector<8x32xf32>, vector<8x32xf32> -> vector<8x32xf32>
    %73 = arith.addf %67, %72 : vector<8x32xf32>
    %74 = vector.extract_strided_slice %56 {offsets = [0, 3, 0, 0], sizes = [1, 1, 8, 8], strides = [1, 1, 1, 1]} : vector<1x4x8x8xf32> to vector<1x1x8x8xf32>
    %75 = vector.shape_cast %74 : vector<1x1x8x8xf32> to vector<1x8x8xf32>
    %76 = vector.shape_cast %75 : vector<1x8x8xf32> to vector<8x8xf32>
    %c24 = arith.constant 24 : index
    %c0_22 = arith.constant 0 : index
    %77 = vector.load %arg4[%c24, %c0_22] : memref<32x32xf32, #tpu.memory_space<vmem>>, vector<8x32xf32>
    %cst_23 = arith.constant dense<0.000000e+00> : vector<8x32xf32>
    %78 = tpu.matmul %76, %77, %cst_23 {dimension_numbers = #tpu.dot_dimension_numbers<[1], [0], [0], [1], [0, 0, 1, 1], [], []>} : vector<8x8xf32>, vector<8x32xf32>, vector<8x32xf32> -> vector<8x32xf32>
    %79 = arith.addf %73, %78 : vector<8x32xf32>
    %c0_24 = arith.constant 0 : index
    %c0_25 = arith.constant 0 : index
    %80 = vector.load %arg5[%c0_24, %c0_25] : memref<1x32xf32, #tpu.memory_space<vmem>>, vector<1x32xf32>
    %81 = vector.broadcast %80 : vector<1x32xf32> to vector<8x32xf32>
    %82 = arith.addf %79, %81 : vector<8x32xf32>
    %83 = vector.shape_cast %82 : vector<8x32xf32> to vector<1x8x32xf32>
    %c0_26 = arith.constant 0 : index
    %c0_27 = arith.constant 0 : index
    %c0_28 = arith.constant 0 : index
    %84 = vector.load %arg6[%c0_26, %c0_27, %c0_28] : memref<1x8x32xf32, #tpu.memory_space<vmem>>, vector<1x8x32xf32>
    tpu.vector_store %arg6[%c0_26, %c0_27, %c0_28], %83 {strides = array<i32>} : memref<1x8x32xf32, #tpu.memory_space<vmem>>, vector<1x8x32xf32>,
    return
  }
  func.func @transform_0(%arg0: i32) -> (i32, i32, i32) {
    %c0_i32 = arith.constant 0 : i32
    %c0_i32_0 = arith.constant 0 : i32
    %c0_i32_1 = arith.constant 0 : i32
    return %arg0, %c0_i32, %c0_i32_0 : i32, i32, i32
  }
  func.func @transform_1(%arg0: i32) -> (i32, i32) {
    %c0_i32 = arith.constant 0 : i32
    %c0_i32_0 = arith.constant 0 : i32
    %c0_i32_1 = arith.constant 0 : i32
    return %c0_i32, %c0_i32_0 : i32, i32
  }
  func.func @transform_2(%arg0: i32) -> (i32, i32) {
    %c0_i32 = arith.constant 0 : i32
    %c0_i32_0 = arith.constant 0 : i32
    %c0_i32_1 = arith.constant 0 : i32
    return %c0_i32, %c0_i32_0 : i32, i32
  }
  func.func @transform_3(%arg0: i32) -> (i32, i32) {
    %c0_i32 = arith.constant 0 : i32
    %c0_i32_0 = arith.constant 0 : i32
    %c0_i32_1 = arith.constant 0 : i32
    return %c0_i32, %c0_i32_0 : i32, i32
  }
  func.func @transform_4(%arg0: i32) -> (i32, i32) {
    %c0_i32 = arith.constant 0 : i32
    %c0_i32_0 = arith.constant 0 : i32
    %c0_i32_1 = arith.constant 0 : i32
    return %c0_i32, %c0_i32_0 : i32, i32
  }
  func.func @transform_5(%arg0: i32) -> (i32, i32, i32) {
    %c0_i32 = arith.constant 0 : i32
    %c0_i32_0 = arith.constant 0 : i32
    %c0_i32_1 = arith.constant 0 : i32
    return %arg0, %c0_i32, %c0_i32_0 : i32, i32, i32
  }
  func.func @transform_6(%arg0: i32) -> (i32, i32, i32, i32) {
    %c0_i32 = arith.constant 0 : i32
    %c0_i32_0 = arith.constant 0 : i32
    %c0_i32_1 = arith.constant 0 : i32
    %c0_i32_2 = arith.constant 0 : i32
    return %arg0, %c0_i32, %c0_i32_0, %c0_i32_1 : i32, i32, i32, i32
  }
}

</mosaic_0001>

<bundles_post_ra>
// kernel: tpu_custom_call.1
= control target key start
LH: loop header
LB: loop body
LE: loop exit
PB: predicated region body
PF: predicated region fallthrough
CT: control target
= control target key end

     0   :  { %s2300_s0 = inlined_call_operand.hbm [shape: f32[2,8,32], index: 0, kind: input, shape index: {}]   ;;  %s2301_s1 = inlined_call_operand.hbm [shape: f32[32,96], index: 1, kind: input, shape index: {}]   ;;  %s2302_s2 = inlined_call_operand.vmem [shape: f32[1,96], index: 2, kind: input, shape index: {}]   ;;  %s2303_s3 = inlined_call_operand.hbm [shape: f32[32,32], index: 3, kind: input, shape index: {}]   ;;  %s2304_s4 = inlined_call_operand.vmem [shape: f32[1,32], index: 4, kind: input, shape index: {}]   ;;  %s2305_s5 = inlined_call_operand.hbm [shape: f32[2,8,32], index: 5, kind: output, shape index: {0}]   ;;  %s2306_s6 = inlined_call_operand.hbm [shape: f32[2,4,8,8], index: 6, kind: output, shape index: {1}]  }
   0x1   :  { %2311 = sst [smem:[#allocation15_spill]] %s2301_s1 }
   0x2   :  { %12 = vsyncpa [#allocation3], 0 }
   0x3   :  { %14 = vsyncpa [#allocation3 + $0x1], 0 }
   0x4   :  { %15 = vsyncpa [#allocation6], 0 }
   0x5   :  { %16 = vsyncpa [#allocation4], 0 }
   0x6   :  { %18 = vsyncpa [#allocation4 + $0x1], 0 }
   0x7   :  { %19 = vsyncpa [#allocation10], 0 }
   0x8   :  { %21 = vsyncpa [#allocation10 + $0x1], 0  ;;  %s1998_s21 = smov 0   ;;  %s2000_s22 = smov 0  }
   0x9   :  { %s2002_s23 = smov 0   ;;  %s2004_s24 = smov 0  }
   0xa LB: > { %s2019_s25 = sadd.s32 4294967295, %s1945_s24   ;;  %s1528_s26 = sadd.s32 4294967294, %s1945_s24   ;;  %s1945_s24 = sphi %s2004_s24, %s2330_s24   ;;  %s1941_s23 = sphi %s2002_s23, %s2329_s23   ;;  %s1937_s22 = sphi %s2000_s22, %s2328_s22   ;;  %s1933_s21 = sphi %s1998_s21, %s2327_s21  }
   0xb   : > { %p47_p0 = scmp.ne.s32.totalorder %s1937_s22, %s1933_s21  ;;  %p2307_p1 = scmp.eq.s32.totalorder %s2019_s25, 0 }
   0xc   : > { %p161_p3 = scmp.eq.s32.totalorder %s1528_s26, 1  ;;  %p1529_p5 = scmp.ge.s32.totalorder %s1945_s24, 1 }
   0xd   : > { %p2028_p4 = por %p2307_p1, %p47_p0  ;;  %p194_p7 = scmp.lt.s32.totalorder %s1945_s24, 3 }
   0xe   : > { %p2033_p6 = por %p161_p3, %p47_p0  ;;  %s1947_s30 = smov [#allocation5]  }
   0xf   : > { %s2312_s27 = scalar_select %p2028_p4, 1, 0 }
  0x10   : > { %s2313_s28 = scalar_select %p2033_p6, 1, 0 }
  0x11   : > { %p2038_p8 = pnand %p1529_p5, %p194_p7  ;;  %s206_s7 = sshll.u32 %s1947_s30, 4  ;;  %s207_s7 = int_to_ptr.vmem [resolvable:$true] %s206_s7 }
  0x12   : > { %s1948_s9 = smov [#allocation7]   ;;  %s1778_s11 = scalar_lea.vmem %s207_s7, 512 }
  0x13   : > { %s2314_s29 = scalar_select %p2038_p8, 1, 0 }
  0x14   : > { %p1682_p9 = pneg %p2038_p8  ;;  %s222_s10 = sshll.u32 %s1948_s9, 4  ;;  %s223_s10 = int_to_ptr.vmem [resolvable:$true] %s222_s10 }
  0x15   : > { %p1779_p13 = scmp.ne.s32.totalorder %s207_s7, %s1778_s11  ;;  %p1786_p5 = scmp.lt.s32.totalorder %s207_s7, %s207_s7 }
  0x16   : > { %p2047_p11 = pnand %p1682_p9, %p2307_p1  ;;  %p1787_p7 = scmp.lt.s32.totalorder %s1778_s11, %s1778_s11 }
  0x18   : > { %p1769_p12 = pneg %p2047_p11  ;;  %p1788_p10 = por %p1787_p7, %p1786_p5 }
  0x1a   : > { %p1781_p0 = pnand %p1779_p13, %p1769_p12 }
  0x1c   : > { %p1782_p3 = pneg %p1781_p0 }
  0x1e   : > { %p1789_p9 = pnand %p1788_p10, %p1782_p3 }
  0x20   : > { %1792 = shalt.err (!%p1789_p9)
}
  0x21   : > { %s1949_s12 = smov 128   ;;  %s1950_s13 = smov 8  }
  0x22   : > { %s2316_s1 = sld [smem:[#allocation15_spill]]  ;;  %s1804_s16 = scalar_lea.vmem %s223_s10, 512 }
  0x23   : > { %p1805_p1 = scmp.ne.s32.totalorder %s223_s10, %s1804_s16  ;;  %p1812_p2 = scmp.lt.s32.totalorder %s223_s10, %s223_s10 }
  0x24   : > { %p1813_p6 = scmp.lt.s32.totalorder %s1804_s16, %s1804_s16 }
  0x25   : > { %p1807_p13 = pnand %p1805_p1, %p1769_p12 }
  0x26   : > { %p1814_p5 = por %p1813_p6, %p1812_p2 }
  0x27   : > { %p1808_p0 = pneg %p1807_p13 }
  0x28   : > { %1685 = dma.hbm_to_vmem [thread:$0]  (!%p2047_p11), %s2316_s1, 512, %s207_s7, [#allocation6], %s1949_s12, %s1949_s12, %s1950_s13  }
  0x29   : > { %p1815_p10 = pnand %p1814_p5, %p1808_p0 }
  0x2b   : > { %1818 = shalt.err (!%p1815_p10)
}
  0x2c   : > { %1688 = dma.hbm_to_vmem [thread:$0]  (!%p2047_p11), %s2303_s3, 512, %s223_s10, [#allocation6], %s1949_s12, %s1949_s12, %s1950_s13  }
  0x2d   : > { %s2070_s19 = sadd.s32 1, %s1945_s24   ;;  %s34_s20 = sadd.s32 1, %s1941_s23 }
  0x2e   : > { %s31_s26 = ssub.s32 %s1945_s24, %s2070_s19  ;;  %p41_p1 = scmp.ne.s32.totalorder %s1941_s23, %s1937_s22 }
  0x2f   : > { %p32_p2 = scmp.eq.s32.totalorder %s31_s26, 0  ;;  %p42_p6 = scmp.eq.s32.totalorder %s1945_s24, 0 }
  0x30   : > { %p2317_p12 = scmp.eq.s32.totalorder %s2019_s25, 1  ;;  %p1702_p7 = scmp.lt.s32.totalorder %s1945_s24, 2 }
  0x31   : > { %s2086_s7 = scalar_select %p32_p2, %s1941_s23, %s34_s20  }
  0x32   : > { %p2080_p3 = por %p2317_p12, %p41_p1  ;;  %p43_p9 = por %p42_p6, %p41_p1 }
  0x33   : > { %s239_s8 = sand.u32 1, %s1941_s23   ;;  %s1534_s10 = sshll.u32 %s1945_s24, 7 }
  0x34   : > { %s2318_s30 = scalar_select %p2080_p3, 1, 0 }
  0x35   : > { %s1533_s9 = sshll.u32 %s239_s8, 3  ;;  %s2093_s13 = scalar_lea.hbm %s2300_s0, %s1534_s10 }
  0x36   : > { %s243_s14 = scalar_lea.vmem [#allocation2], %s1533_s9  ;;  %p2095_p11 = pnand %p1702_p7, %p43_p9 }
  0x37   : > { %s250_s15 = sshll.u32 %s243_s14, 4  ;;  %s240_s17 = scalar_lea.sflag [#allocation3], %s239_s8  ;;  %s251_s15 = int_to_ptr.vmem [resolvable:$true] %s250_s15 }
  0x38   : > { %s1819_s18 = scalar_lea.hbm %s2093_s13, 128  ;;  %p1821_p0 = pneg %p2095_p11 }
  0x39   : > { %p1820_p13 = scmp.ne.s32.totalorder %s2093_s13, %s1819_s18  ;;  %s1824_s10 = scalar_lea.hbm %s2300_s0, 256 }
  0x3a   : > { %p1825_p1 = scmp.lt.s32.totalorder %s2093_s13, %s2300_s0  ;;  %p1826_p2 = scmp.lt.s32.totalorder %s1824_s10, %s1819_s18 }
  0x3b   : > { %p1822_p5 = pnand %p1821_p0, %p1820_p13 }
  0x3c   : > { %p1827_p6 = por %p1826_p2, %p1825_p1 }
  0x3d   : > { %p1823_p10 = pneg %p1822_p5 }
  0x3f   : > { %p1828_p12 = pnand %p1827_p6, %p1823_p10 }
  0x41   : > { %1831 = shalt.err (!%p1828_p12)
}
  0x42   : > { %s1832_s12 = scalar_lea.vmem %s251_s15, 128  ;;  %s1951_s8 = smov [#allocation2]  }
  0x43   : > { %p1833_p7 = scmp.ne.s32.totalorder %s251_s15, %s1832_s12  ;;  %s1837_s14 = sshll.u32 %s1951_s8, 4  ;;  %s1838_s14 = int_to_ptr.vmem [resolvable:$false] %s1837_s14 }
  0x44   : > { %s1839_s1 = scalar_lea.vmem %s1838_s14, 256  ;;  %p1840_p13 = scmp.lt.s32.totalorder %s251_s15, %s1838_s14 }
  0x45   : > { %p1835_p9 = pnand %p1833_p7, %p1821_p0  ;;  %p1841_p5 = scmp.lt.s32.totalorder %s1839_s1, %s1832_s12 }
  0x47   : > { %p1836_p3 = pneg %p1835_p9  ;;  %p1842_p4 = por %p1841_p5, %p1840_p13 }
  0x49   : > { %p1843_p8 = pnand %p1842_p4, %p1836_p3 }
  0x4b   : > { %1846 = shalt.err (!%p1843_p8)
}
  0x4c   : > { %1692 = dma.hbm_to_vmem [thread:$0]  (!%p2095_p11), %s2093_s13, 128, %s251_s15, %s240_s17  }
  0x4d   : > { %p2320_p10 = scmp.ne.s32.totalorder %s2314_s29, 0 }
  0x4e   : > { %s2116_s18 = sand.u32 (!%p2320_p10), 1, %s1937_s22   ;;  %p2321_p4 = scmp.ne.s32.totalorder (!%p2320_p10), %s2312_s27, 0 }
  0x4f   : > { %259 = sbr.rel (%p2320_p10) target bundleno = 1443 (0x5a3), region = 40  ;;  %s1536_s20 = sshll.u32 (!%p2320_p10), %s2116_s18, 3 }
  0x50   : > { %s262_s26 = scalar_lea.sflag (!%p2320_p10), [#allocation3], %s2116_s18  ;;  %s265_s1 = scalar_lea.vmem (!%p2320_p10), [#allocation2], %s1536_s20 }
  0x54   : > { %1916 = dma.done.wait (%p2321_p4), %s262_s26, 128  }
  0x55   : > { %1918 = vsyncadd (%p2321_p4), %s262_s26, 4294967168  ;;  %p2322_p8 = scmp.eq.s32.totalorder %s2019_s25, 0 }
  0x57   : > { %1920 = dma.done.wait (%p2322_p8), [#allocation6], 1024   ;;  %p2323_p3 = pmov %p2322_p8 }
  0x58   : > { %v1952_v0 = vmov 0.0   ;;  %vm1953_vm0 = vmmov 0   ;;  %v311_v1 = vld [vmem:[#allocation5 + $0x18] sm:$0xff]  ;;  %v310_v2 = vld [vmem:[#allocation5 + $0x10] sm:$0xff]  ;;  %v309_v3 = vld [vmem:[#allocation5 + $0x8] sm:$0xff]  ;;  %vm319_vm1 = vcmask 261120  }
  0x59   : > { %1922 = vsyncadd (%p2323_p3), [#allocation6], 4294966272  ;;  %1597 = vmatprep.subr.mxu0 %v1952_v0  ;;  %1605 = vmatprep.mubr.msk.f32.mxu0 %vm1953_vm0, %v1952_v0  ;;  %v308_v4 = vld [vmem:[#allocation5] sm:$0xff]  ;;  %v307_v5 = vld [vmem:[%s265_s1] sm:$0xff]  ;;  %s1954_s13 = smov 104   ;;  %s1955_s15 = smov 120  }
  0x5a   : > { %1608 = vmatprep.subr.mxu1 %v1952_v0  ;;  %1610 = vmatprep.mubr.msk.f32.mxu1 %vm1953_vm0, %v1952_v0  ;;  %v1541_v6 = vld [vmem:[%s2302_s2] ss:$0 sm:$0xff]  ;;  %s1956_s16 = smov 96   ;;  %s1957_s17 = smov 112   ;;  %vm410_vm2 = vcmask 64512  }
  0x5b   : > { %1598 = vmatpush3.msra.mxu0 %v311_v1  ;;  %s1958_s10 = smov 64   ;;  %s1540_s11 = sshll.u32 %s2116_s18, 5 }
  0x5c   : > { %1599 = vmatprep.subr.mxu0 %v1952_v0  ;;  %s2192_s9 = scalar_lea.vmem [#allocation9], %s1540_s11  ;;  %s1567_s12 = sshll.u32 %s2019_s25, 9 }
  0x5d   : > { %1600 = vmatpush3.msra.mxu0 %v310_v2  ;;  %s1404_s8 = sshll.u32 %s2192_s9, 4  ;;  %s2232_s1 = scalar_lea.hbm %s2306_s6, %s1567_s12  ;;  %s2234_s8 = int_to_ptr.vmem [resolvable:$true] %s1404_s8 }
  0x5e   : > { %1601 = vmatprep.subr.mxu0 %v1952_v0  ;;  %s1378_s27 = scalar_lea.sflag [#allocation10], %s2116_s18  ;;  %s1847_s29 = scalar_lea.vmem %s2234_s8, 512 }
  0x5f   : > { %1602 = vmatpush3.msra.mxu0 %v309_v3  ;;  %p1848_p11 = scmp.ne.s32.totalorder %s2234_s8, %s1847_s29  ;;  %p2324_p0 = scmp.ne.s32.totalorder %s2318_s30, 0 }
  0x60   : > { %1603 = vmatprep.subr.mxu0 %v1952_v0 }
  0x61   : > { %1604 = vmatpush3.msra.mxu0 %v308_v4  ;;  %p1849_p1 = pnand %p1848_p11, %p2324_p0 }
  0x62   : > { %1606 = vmatmul.mubr.msk.f32.vlgmr.msra.gmra.mxu0 %vm319_vm1, %v307_v5  ;;  %1618 = vmatprep.subr.mxu0 %v1952_v0 }
  0x63   : > { %1620 = vmatprep.mubr.msk.f32.mxu0 %vm1953_vm0, %v1952_v0  ;;  %p1850_p2 = pneg %p1849_p1 }
 0x122   : > { %v389_v7 = vpop.f32.mrf.mxu0 }
 0x123   : > { %v390_v8 = vadd.f32 %v1541_v6, %v389_v7  ;;  %v1065_v6 = vld [vmem:[#allocation7] sm:$0xff]  ;;  %v1066_v7 = vld [vmem:[#allocation7 + $0x8] sm:$0xff] }
 0x124   : > { %v1607_v9 = vpop.f32.mrf.mxu0 }
 0x125   : > { %406 = vrot.lane.b32.xlu1 %v390_v8, %s1954_s13  ;;  %402 = vrot.lane.b32.xlu0 %v390_v8, %s1955_s15  ;;  %v393_v10 = vmul.f32 0.35355338, %v390_v8 }
 0x129   : > { %408 = vrot.lane.b32.xlu1 %v390_v8, %s1956_s16  ;;  %404 = vrot.lane.b32.xlu0 %v390_v8, %s1957_s17 }
 0x12d   : > { %395 = vrot.lane.b32.xlu1 %v393_v10, %s1955_s15 }
 0x197   : > { %v2146_v11 = vpop.permute.xlu1 %406  ;;  %v2148_v12 = vpop.permute.xlu0 %402 }
 0x198   : > { %485 = vrot.lane.b32.xlu0 %v2148_v12, %s1956_s16  ;;  %637 = vrot.lane.b32.xlu1 %v2146_v11, %s1956_s16 }
 0x19b   : > { %v409_v13 = vpop.permute.xlu1 %408  ;;  %v2152_v14 = vpop.permute.xlu0 %404 }
 0x19c   : > { %1609 = vmatpush3.xpose.msk.msra.mxu1 %vm410_vm2, %v409_v13  ;;  %561 = vrot.lane.b32.xlu0 %v2152_v14, %s1956_s16 }
 0x19d   : > { %399 = vrot.lane.b32.xlu1 %v393_v10, %s1954_s13  ;;  %1613 = vmatprep.subr.mxu1 %v1952_v0  ;;  %s1959_s13 = smov [#allocation9]  }
 0x19e   : > { %s1851_s15 = sshll.u32 %s1959_s13, 4  ;;  %s1852_s15 = int_to_ptr.vmem [resolvable:$false] %s1851_s15 }
 0x19f   : > { %1611 = vmatmul.mubr.msk.f32.vlgmr.msra.gmra.mxu1 %vm410_vm2, %v393_v10  ;;  %v396_v15 = vpop.permute.xlu1 %395  ;;  %s1853_s16 = scalar_lea.vmem %s1852_s15, 1024  ;;  %p1854_p6 = scmp.lt.s32.totalorder %s2234_s8, %s1852_s15 }
 0x1a0   : > { %397 = vrot.lane.b32.xlu0 %v393_v10, %s1957_s17  ;;  %1615 = vmatprep.mubr.msk.f32.mxu1 %vm1953_vm0, %v1952_v0  ;;  %p1855_p12 = scmp.lt.s32.totalorder %s1853_s16, %s1847_s29 }
 0x1a2   : > { %p1856_p7 = por %p1855_p12, %p1854_p6 }
 0x1a4   : > { %p1857_p9 = pnand %p1856_p7, %p1850_p2 }
 0x20a   : > { %v486_v16 = vpop.permute.xlu0 %485  ;;  %v638_v17 = vpop.permute.xlu1 %637 }
 0x20b   : > { %1614 = vmatpush3.xpose.msk.msra.mxu1 %vm410_vm2, %v486_v16 }
 0x20c   : > { %1623 = vmatprep.subr.mxu1 %v1952_v0 }
 0x20e   : > { %v562_v18 = vpop.permute.xlu0 %561  ;;  %1616 = vmatmul.mubr.msk.f32.vlgmr.msra.gmra.mxu1 %vm410_vm2, %v396_v15 }
 0x20f   : > { %1619 = vmatpush3.xpose.msk.msra.mxu0 %vm410_vm2, %v562_v18  ;;  %1624 = vmatpush3.xpose.msk.msra.mxu1 %vm410_vm2, %v638_v17  ;;  %v400_v19 = vpop.permute.xlu1 %399 }
 0x210   : > { %1625 = vmatprep.mubr.msk.f32.mxu1 %vm1953_vm0, %v1952_v0  ;;  %1628 = vmatprep.subr.mxu0 %v1952_v0 }
 0x211   : > { %1633 = vmatprep.subr.mxu1 %v1952_v0 }
 0x212   : > { %v398_v20 = vpop.permute.xlu0 %397  ;;  %1626 = vmatmul.mubr.msk.f32.vlgmr.msra.gmra.mxu1 %vm410_vm2, %v400_v19 }
 0x213   : > { %1621 = vmatmul.mubr.msk.f32.vlgmr.msra.gmra.mxu0 %vm410_vm2, %v398_v20  ;;  %1635 = vmatprep.mubr.msk.f32.mxu1 %vm1953_vm0, %v1952_v0 }
 0x214   : > { %1630 = vmatprep.mubr.msk.f32.mxu0 %vm1953_vm0, %v1952_v0 }
 0x25f   : > { %v481_v21 = vpop.f32.mrf.mxu1 }
 0x260   : > { %v713_v22 = vsel %vm410_vm2, %v481_v21, -inf }
 0x261   : > { %714 = vmax.xlane.f32.xlu0 %v713_v22  ;;  %v1612_v23 = vpop.f32.mrf.mxu1 }
 0x2ce   : > { %v557_v24 = vpop.f32.mrf.mxu1 }
 0x2cf   : > { %v716_v25 = vsel %vm410_vm2, %v557_v24, -inf }
 0x2d0   : > { %717 = vmax.xlane.f32.xlu1 %v716_v25  ;;  %v1617_v26 = vpop.f32.mrf.mxu1 }
 0x2d2   : > { %v709_v27 = vpop.f32.mrf.mxu1 }
 0x2d3   : > { %v633_v28 = vpop.f32.mrf.mxu0  ;;  %v722_v32 = vsel %vm410_vm2, %v709_v27, -inf }
 0x2d4   : > { %v1627_v29 = vpop.f32.mrf.mxu1  ;;  %v719_v30 = vsel %vm410_vm2, %v633_v28, -inf }
 0x2d5   : > { %720 = vmax.xlane.f32.xlu0 %v719_v30  ;;  %v1622_v31 = vpop.f32.mrf.mxu0 }
 0x2d9   : > { %723 = vmax.xlane.f32.xlu0 %v722_v32 }
 0x2e1   : > { %761 = vrot.lane.b32.xlu1 %v390_v8, %s1958_s10  ;;  %v1288_v8 = vld [vmem:[#allocation7 + $0x18] sm:$0xff] }
 0x2ea   : > { %v715_v33 = vpop.xlane.xlu0 %714 }
 0x2eb   : > { %v725_v34 = vsub.f32 %v481_v21, %v715_v33 }
 0x2ed   : > { %v729_v35 = vmul.f32 1.442695, %v725_v34 }
 0x2ef   : > { %1751 = vpow2.f32 %v729_v35 }
 0x2fc   : > { %v1752_v36 = vpop.eup %1751 }
 0x2fd   : > { %v737_v37 = vsel %vm410_vm2, %v1752_v36, 0.0 }
 0x305   : > { %738 = vadd.xlane.f32.xlu1 %v737_v37 }
 0x359   : > { %v718_v38 = vpop.xlane.xlu1 %717 }
 0x35a   : > { %v726_v39 = vsub.f32 %v557_v24, %v718_v38 }
 0x35c   : > { %v731_v40 = vmul.f32 1.442695, %v726_v39 }
 0x35d   : > { %v762_v41 = vpop.permute.xlu1 %761 }
 0x35e   : > { %1753 = vpow2.f32 %v731_v40  ;;  %1629 = vmatpush3.msra.mxu0 %v762_v41  ;;  %v721_v42 = vpop.xlane.xlu0 %720 }
 0x35f   : > { %v727_v43 = vsub.f32 %v633_v28, %v721_v42  ;;  %1638 = vmatprep.subr.mxu0 %v1952_v0 }
 0x361   : > { %v733_v44 = vmul.f32 1.442695, %v727_v43 }
 0x362   : > { %v724_v45 = vpop.xlane.xlu0 %723 }
 0x363   : > { %1755 = vpow2.f32 %v733_v44  ;;  %v728_v46 = vsub.f32 %v709_v27, %v724_v45 }
 0x365   : > { %v735_v47 = vmul.f32 1.442695, %v728_v46 }
 0x367   : > { %1757 = vpow2.f32 %v735_v47 }
 0x36b   : > { %v1754_v48 = vpop.eup %1753 }
 0x36c   : > { %v740_v49 = vsel %vm410_vm2, %v1754_v48, 0.0 }
 0x36d   : > { %741 = vadd.xlane.f32.xlu0 %v740_v49 }
 0x370   : > { %v1756_v50 = vpop.eup %1755 }
 0x371   : > { %v743_v51 = vsel %vm410_vm2, %v1756_v50, 0.0 }
 0x372   : > { %744 = vadd.xlane.f32.xlu1 %v743_v51 }
 0x374   : > { %v1758_v52 = vpop.eup %1757 }
 0x375   : > { %v746_v53 = vsel %vm410_vm2, %v1758_v52, 0.0 }
 0x376   : > { %747 = vadd.xlane.f32.xlu0 %v746_v53 }
 0x383   : > { %913 = vrot.lane.b32.xlu1 %v2152_v14, %s1958_s10 }
 0x387   : > { %989 = vrot.lane.b32.xlu1 %v2146_v11, %s1958_s10  ;;  %v1213_v11 = vld [vmem:[#allocation7 + $0x10] sm:$0xff] }
 0x38c   : > { %837 = vrot.lane.b32.xlu0 %v2148_v12, %s1958_s10 }
 0x38e   : > { %v739_v54 = vpop.xlane.xlu1 %738 }
 0x38f   : > { %1759 = vrcp.f32 %v739_v54 }
 0x39c   : > { %v1760_v55 = vpop.eup %1759 }
 0x39d   : > { %v753_v56 = vmul.f32 %v1760_v55, %v1752_v36 }
 0x39f   : > { %757 = vst.msk [vmem:[%s2192_s9] sm:$0xff] %vm410_vm2, %v753_v56  ;;  %1631 = vmatmul.mubr.msk.f32.vlgmr.msra.gmra.mxu0 %vm410_vm2, %v753_v56 }
 0x3a0   : > { %1640 = vmatprep.mubr.msk.f32.mxu0 %vm1953_vm0, %v1952_v0 }
 0x3f6   : > { %v742_v57 = vpop.xlane.xlu0 %741 }
 0x3f7   : > { %1761 = vrcp.f32 %v742_v57 }
 0x3fb   : > { %v745_v58 = vpop.xlane.xlu1 %744 }
 0x3fc   : > { %1763 = vrcp.f32 %v745_v58 }
 0x3ff   : > { %v914_v59 = vpop.permute.xlu1 %913  ;;  %v748_v60 = vpop.xlane.xlu0 %747 }
 0x400   : > { %1765 = vrcp.f32 %v748_v60  ;;  %1639 = vmatpush3.msra.mxu0 %v914_v59 }
 0x401   : > { %1648 = vmatprep.subr.mxu0 %v1952_v0 }
 0x403   : > { %v838_v61 = vpop.permute.xlu0 %837  ;;  %v990_v1 = vpop.permute.xlu1 %989 }
 0x404   : > { %v1762_v62 = vpop.eup %1761  ;;  %1634 = vmatpush3.msra.mxu1 %v838_v61 }
 0x405   : > { %1643 = vmatprep.subr.mxu1 %v1952_v0  ;;  %v754_v63 = vmul.f32 %v1762_v62, %v1754_v48 }
 0x407   : > { %758 = vst.msk [vmem:[%s2192_s9 + $0x8] sm:$0xff] %vm410_vm2, %v754_v63  ;;  %1636 = vmatmul.mubr.msk.f32.vlgmr.msra.gmra.mxu1 %vm410_vm2, %v754_v63 }
 0x408   : > { %1644 = vmatpush3.msra.mxu1 %v990_v1  ;;  %1645 = vmatprep.mubr.msk.f32.mxu1 %vm1953_vm0, %v1952_v0 }
 0x409   : > { %v1764_v2 = vpop.eup %1763  ;;  %1653 = vmatprep.subr.mxu1 %v1952_v0 }
 0x40a   : > { %v755_v3 = vmul.f32 %v1764_v2, %v1756_v50 }
 0x40c   : > { %759 = vst.msk [vmem:[%s2192_s9 + $0x10] sm:$0xff] %vm410_vm2, %v755_v3  ;;  %1641 = vmatmul.mubr.msk.f32.vlgmr.msra.gmra.mxu0 %vm410_vm2, %v755_v3 }
 0x40d   : > { %v1766_v4 = vpop.eup %1765  ;;  %1650 = vmatprep.mubr.msk.f32.mxu0 %vm1953_vm0, %v1952_v0  ;;  %1649 = vmatpush3.msra.mxu0 %v1066_v7 }
 0x40e   : > { %v756_v5 = vmul.f32 %v1766_v4, %v1758_v52  ;;  %1658 = vmatprep.subr.mxu0 %v1952_v0 }
 0x410   : > { %760 = vst.msk [vmem:[%s2192_s9 + $0x18] sm:$0xff] %vm410_vm2, %v756_v5  ;;  %1646 = vmatmul.mubr.msk.f32.vlgmr.msra.gmra.mxu1 %vm410_vm2, %v756_v5 }
 0x411   : > { %1654 = vmatpush3.msra.mxu1 %v1065_v6  ;;  %1655 = vmatprep.mubr.msk.f32.mxu1 %vm1953_vm0, %v1952_v0 }
 0x412   : > { %1663 = vmatprep.subr.mxu1 %v1952_v0 }
 0x45f   : > { %v833_v9 = vpop.f32.mrf.mxu0 }
 0x460   : > { %1656 = vmatmul.mubr.msk.f32.vlgmr.msra.gmra.mxu1 %vm410_vm2, %v833_v9 }
 0x461   : > { %v1632_v10 = vpop.f32.mrf.mxu0  ;;  %1664 = vmatpush3.msra.mxu1 %v1288_v8  ;;  %1665 = vmatprep.mubr.msk.f32.mxu1 %vm1953_vm0, %v1952_v0 }
 0x4c7   : > { %v909_v12 = vpop.f32.mrf.mxu1 }
 0x4c8   : > { %1651 = vmatmul.mubr.msk.f32.vlgmr.msra.gmra.mxu0 %vm410_vm2, %v909_v12 }
 0x4c9   : > { %v1637_v13 = vpop.f32.mrf.mxu1  ;;  %1659 = vmatpush3.msra.mxu0 %v1213_v11  ;;  %1660 = vmatprep.mubr.msk.f32.mxu0 %vm1953_vm0, %v1952_v0 }
 0x4cc   : > { %v985_v14 = vpop.f32.mrf.mxu0 }
 0x4cd   : > { %1661 = vmatmul.mubr.msk.f32.vlgmr.msra.gmra.mxu0 %vm410_vm2, %v985_v14 }
 0x4ce   : > { %v1642_v15 = vpop.f32.mrf.mxu0 }
 0x4d0   : > { %v1061_v16 = vpop.f32.mrf.mxu1 }
 0x4d1   : > { %1666 = vmatmul.mubr.msk.f32.vlgmr.msra.gmra.mxu1 %vm410_vm2, %v1061_v16 }
 0x4d2   : > { %v1647_v17 = vpop.f32.mrf.mxu1 }
 0x4d3   : > { %1860 = shalt.err (!%p1857_p9)
}
 0x4d4   : > { %s1861_s17 = scalar_lea.hbm %s2232_s1, 512  ;;  %s1865_s9 = scalar_lea.hbm %s2306_s6, 1024 }
 0x4d5   : > { %p1862_p13 = scmp.ne.s32.totalorder %s2232_s1, %s1861_s17  ;;  %p1866_p4 = scmp.lt.s32.totalorder %s2232_s1, %s2306_s6 }
 0x4d6   : > { %p1867_p8 = scmp.lt.s32.totalorder %s1865_s9, %s1861_s17 }
 0x4d7   : > { %p1863_p5 = pnand %p1862_p13, %p2324_p0 }
 0x4d8   : > { %p1868_p3 = por %p1867_p8, %p1866_p4 }
 0x4d9   : > { %p1864_p10 = pneg %p1863_p5 }
 0x4db   : > { %p1869_p11 = pnand %p1868_p3, %p1864_p10 }
 0x4dd   : > { %1872 = shalt.err (!%p1869_p11)
}
 0x4de   : > { %s1960_s26 = smov 128   ;;  %s1961_s29 = smov 8   ;;  %v1559_v26 = vld [vmem:[%s2304_s4] ss:$0 sm:$0xff] }
 0x4df   : > { %1679 = dma.vmem_to_hbm [thread:$0]  (%p2324_p0), %s2234_s8, 512, %s2232_s1, %s1378_s27, %s1960_s26, %s1960_s26, %s1961_s29  }
 0x4e0   : > { %s1562_s16 = sshll.u32 %s2019_s25, 7  ;;  %s299_s17 = scalar_lea.vmem [#allocation8], %s1536_s20 }
 0x4e1   : > { %s1391_s10 = sshll.u32 %s299_s17, 4  ;;  %s1389_s27 = scalar_lea.hbm %s2305_s5, %s1562_s16  ;;  %s1392_s10 = int_to_ptr.vmem [resolvable:$true] %s1391_s10 }
 0x4e2   : > { %s1373_s11 = scalar_lea.sflag [#allocation4], %s2116_s18  ;;  %s1873_s9 = scalar_lea.vmem %s1392_s10, 128 }
 0x4e3   : > { %p1874_p1 = scmp.ne.s32.totalorder %s1392_s10, %s1873_s9  ;;  %s1962_s25 = smov [#allocation8]  }
 0x4e4   : > { %s1877_s12 = sshll.u32 %s1962_s25, 4  ;;  %s1878_s12 = int_to_ptr.vmem [resolvable:$false] %s1877_s12 }
 0x4e5   : > { %p1875_p2 = pnand %p1874_p1, %p2324_p0  ;;  %s1879_s20 = scalar_lea.vmem %s1878_s12, 256 }
 0x4e6   : > { %p1880_p12 = scmp.lt.s32.totalorder %s1392_s10, %s1878_s12  ;;  %p1881_p7 = scmp.lt.s32.totalorder %s1879_s20, %s1873_s9 }
 0x4e7   : > { %p1876_p6 = pneg %p1875_p2 }
 0x4e8   : > { %p1882_p9 = por %p1881_p7, %p1880_p12 }
 0x4ea   : > { %p1883_p13 = pnand %p1882_p9, %p1876_p6 }
 0x520   : > { %v1209_v0 = vpop.f32.mrf.mxu1 }
 0x522   : > { %v1657_v18 = vpop.f32.mrf.mxu1 }
 0x588   : > { %v1136_v19 = vpop.f32.mrf.mxu0 }
 0x589   : > { %v1210_v22 = vadd.f32 %v1209_v0, %v1136_v19 }
 0x58a   : > { %v1652_v20 = vpop.f32.mrf.mxu0 }
 0x58d   : > { %v1283_v21 = vpop.f32.mrf.mxu0 }
 0x58e   : > { %v1287_v24 = vadd.f32 %v1283_v21, %v1210_v22 }
 0x58f   : > { %v1662_v23 = vpop.f32.mrf.mxu0 }
 0x591   : > { %v1358_v25 = vpop.f32.mrf.mxu1 }
 0x592   : > { %v1362_v27 = vadd.f32 %v1358_v25, %v1287_v24 }
 0x593   : > { %v1667_v28 = vpop.f32.mrf.mxu1 }
 0x594   : > { %v1370_v29 = vadd.f32 %v1559_v26, %v1362_v27 }
 0x596   : > { %1371 = vst.msk [vmem:[%s299_s17] sm:$0xff] %vm319_vm1, %v1370_v29 }
 0x597   : > { %1886 = shalt.err (!%p1883_p13)
}
 0x598   : > { %s1887_s14 = scalar_lea.hbm %s1389_s27, 128  ;;  %s1891_s29 = scalar_lea.hbm %s2305_s5, 256 }
 0x599   : > { %p1888_p5 = scmp.ne.s32.totalorder %s1389_s27, %s1887_s14  ;;  %p1892_p8 = scmp.lt.s32.totalorder %s1389_s27, %s2305_s5 }
 0x59a   : > { %p1893_p3 = scmp.lt.s32.totalorder %s1891_s29, %s1887_s14 }
 0x59b   : > { %p1889_p10 = pnand %p1888_p5, %p2324_p0 }
 0x59c   : > { %p1894_p11 = por %p1893_p3, %p1892_p8 }
 0x59d   : > { %p1890_p4 = pneg %p1889_p10 }
 0x59f   : > { %p1895_p1 = pnand %p1894_p11, %p1890_p4 }
 0x5a1   : > { %1898 = shalt.err (!%p1895_p1)
}
 0x5a2   : > { %1678 = dma.vmem_to_hbm [thread:$0]  (%p2324_p0), %s1392_s10, 128, %s1389_s27, %s1373_s11  }
 0x5a3 PF: > { %s1419_s16 = sand.u32 1, %s1933_s21   ;;  %p2325_p2 = scmp.ne.s32.totalorder %s2313_s28, 0 }
 0x5a4   : > { %p2326_p6 = scmp.ge.s32.totalorder %s1945_s24, 2  ;;  %s1420_s17 = scalar_lea.sflag [#allocation4], %s1419_s16 }
 0x5a6   : > { %p1694_p12 = pnand %p2326_p6, %p2325_p2 }
 0x5a8   : > { %p1695_p7 = pneg %p1694_p12 }
 0x5aa   : > { %1924 = dma.done.wait (%p1695_p7), %s1420_s17, 128  }
 0x5ab   : > { %1926 = vsyncadd (%p1695_p7), %s1420_s17, 4294967168  ;;  %s1429_s8 = scalar_lea.sflag [#allocation10], %s1419_s16 }
 0x5ac   : > { %1928 = dma.done.wait (%p1695_p7), %s1429_s8, 512  }
 0x5ad   : > { %1930 = vsyncadd (%p1695_p7), %s1429_s8, 4294966784  ;;  %p24_p0 = scmp.ge.s32.totalorder %s2070_s19, 4   ;;  %s2327_s21 = smov %s1937_s22 }
 0x5ae   : > { %s2328_s22 = smov %s1941_s23  ;;  %s2329_s23 = smov %s2086_s7 }
 0x5af   : > { %s2330_s24 = smov %s2070_s19  ;;  %26 = sbr.rel (!%p24_p0) target bundleno = 10 (0xa), region = 110 }
 0x5b4   :  { %1434 = vsyncpa [#allocation3], 1 }
 0x5b5   :  { %1436 = vsyncpa [#allocation3 + $0x1], 1 }
 0x5b6   :  { %1437 = vsyncpa [#allocation6], 1 }
 0x5b7   :  { %1438 = vsyncpa [#allocation4], 1 }
 0x5b8   :  { %1440 = vsyncpa [#allocation4 + $0x1], 1 }
 0x5b9   :  { %1441 = vsyncpa [#allocation10], 1 }
 0x5ba   :  { %1443 = vsyncpa [#allocation10 + $0x1], 1 }

</bundles_post_ra>
